<compile_context>
chip_gen: v5e
topology: v5e:2x2
jax: 0.10.0
libtpu: 0.0.40
codegen_flags: <defaults>
</compile_context>

<pallas_src>
import jax
import jax.numpy as jnp
from jax import lax
from jax.experimental import pallas as pl
from jax.experimental.pallas import tpu as pltpu

# ---------------- model hyper-parameters (small, consistent with the module) ----------
B = 2            # batch
L = 256          # signal length (PyTorch 'x' is (batch, len))
K = 5            # conv kernel size
PAD = 2          # 'same' padding
C = 32           # conv output channels (hidden)
NCLS = 5         # basecaller classes (blank + ACGT)
NCLS_PAD = 8     # classes padded to a full sublane tile (unmasked stores, aligned MXU M-dim)
BL = B * L       # batch folded onto the lane axis
P_ROWS = C + NCLS_PAD    # packed-parameter rows
P_COLS = C + 1           # packed-parameter cols
NEG_FILL = -1e30         # finite "-inf": filler-class bias; exp underflows to 0, no NaNs


def _basecall_kernel(x_ref, p_ref, out_ref):
    """Single invocation (no grid); whole batch lives on the lane axis.

    x_ref   : (1, B*L)            raw signal, batch-major flattened (lane-dense)
    p_ref   : (C+NCLS_PAD, C+1)   packed params:
                                    rows [0, C)            -> [w1 (C,K) | b1 (C,1)]
                                    rows [C, C+NCLS_PAD)   -> [w2 padded (8,C) | b2 padded (8,1)]
                                  (filler class rows: zero weights, bias = NEG_FILL)
    out_ref : (B, NCLS_PAD, L)    per-timestep class log-probs; class rows >= NCLS are
                                  ~NEG_FILL filler and MUST be sliced off by the caller.
    """
    xf = x_ref[...]                                            # (1, BL) f32

    # Lane position within each length-L batch segment: used both for the 'same'
    # zero-padding at sequence edges and to stop conv taps leaking across batches.
    lane = lax.broadcasted_iota(jnp.int32, (1, BL), 1)
    pos = lane % L

    # Conv1d(1 -> C, k=K, padding=PAD) as K VPU broadcast-FMAs (no im2col, no MXU).
    # Lane shifts go through pltpu.roll (XLU slot); the masks zero wrapped/cross-batch lanes.
    acc = None
    for k in range(K):
        d = k - PAD                                            # tap offset in [-PAD, PAD]
        if d == 0:
            sh = xf
        else:
            sh = pltpu.roll(xf, (-d) % BL, 1)                  # result[i] = xf[i + d] (wrapped)
            if d > 0:
                sh = jnp.where(pos < (L - d), sh, 0.0)         # right edge / cross-batch leak
            else:
                sh = jnp.where(pos >= (-d), sh, 0.0)           # left edge / cross-batch leak
        term = p_ref[0:C, k:k + 1] * sh                        # (C,1)*(1,BL) -> (C,BL)
        acc = term if acc is None else acc + term

    h = jnp.maximum(acc + p_ref[0:C, K:K + 1], 0.0)            # bias + ReLU  (C, BL)

    # Pointwise Linear(C -> NCLS_PAD) on the MXU: (8,C) @ (C,BL) -> (8,BL).
    # Filler rows: 0-weights + NEG_FILL bias -> huge negative logits.
    logits = jnp.dot(p_ref[C:C + NCLS_PAD, 0:C], h,
                     preferred_element_type=jnp.float32) + p_ref[C:C + NCLS_PAD, C:C + 1]

    # log_softmax over the class axis (sublanes); filler rows contribute exp(...)≈0.
    m = jnp.max(logits, axis=0, keepdims=True)
    s = logits - m
    lse = jnp.log(jnp.sum(jnp.exp(s), axis=0, keepdims=True))
    logp = s - lse                                             # (NCLS_PAD, BL)

    # Emit (B, NCLS_PAD, L) directly: one full unmasked (8, 256) store per batch element.
    for b in range(B):
        out_ref[b] = logp[:, b * L:(b + 1) * L]


def pack_params(w1, b1, w2, b2):
    """Pack the four tiny parameter tensors into one VMEM-resident array.

    Done once per weight load/update (hoisted out of the per-forward path).
    """
    params = jnp.zeros((P_ROWS, P_COLS), jnp.float32)
    params = params.at[0:C, 0:K].set(w1)
    params = params.at[0:C, K:K + 1].set(b1)
    params = params.at[C:C + NCLS, 0:C].set(w2)
    params = params.at[C:C + NCLS, C:C + 1].set(b2)
    # Filler class rows: weights stay zero, bias = NEG_FILL -> logits ~ -1e30.
    params = params.at[C + NCLS:C + NCLS_PAD, C:C + 1].set(NEG_FILL)
    return params


@jax.jit
def basecall_forward(x, params):
    """x: (B, L) raw signal; params: packed via pack_params.
    Returns (B, NCLS, L) log-probabilities (torch NCL layout)."""
    # Fold the batch onto the lane axis: (B, L) -> (1, B*L) is a free relayout of a
    # contiguous row-major array (no padding, no extra HBM pass).
    xf = x.reshape(1, BL)

    out_padded = pl.pallas_call(
        _basecall_kernel,
        out_shape=jax.ShapeDtypeStruct((B, NCLS_PAD, L), jnp.float32),
        in_specs=[
            pl.BlockSpec(memory_space=pltpu.MemorySpace.VMEM),   # whole signal slab
            pl.BlockSpec(memory_space=pltpu.MemorySpace.VMEM),   # packed params
        ],
        out_specs=pl.BlockSpec(memory_space=pltpu.MemorySpace.VMEM),
    )(xf, params)

    # Drop the filler class rows; layout already matches torch (B, NCLS, L).
    return out_padded[:, :NCLS, :]


def _reference_forward(x, w1, b1, w2, b2):
    """Pure-JAX reference matching the kernel semantics (and PyTorch's Conv1d/Linear)."""
    xpad = jnp.pad(x, ((0, 0), (PAD, PAD)))                                   # (B, LP)
    h = sum(w1[None, :, k:k + 1] * xpad[:, None, k:k + L] for k in range(K))  # (B, C, L)
    h = jnp.maximum(h + b1[None, :, :], 0.0)
    logits = jnp.einsum("nc,bcl->bnl", w2, h) + b2[None, :, :]                # (B, NCLS, L)
    return jax.nn.log_softmax(logits, axis=1)


if __name__ == "__main__":
    key = jax.random.PRNGKey(0)
    kx, k1, k2, k3, k4 = jax.random.split(key, 5)

    # Deterministic inputs + parameters; init_weights(): uniform(-0.08, 0.08).
    x = jax.random.normal(kx, (B, L), dtype=jnp.float32)
    w1 = jax.random.uniform(k1, (C, K), jnp.float32, -0.08, 0.08)
    b1 = jax.random.uniform(k2, (C, 1), jnp.float32, -0.08, 0.08)
    w2 = jax.random.uniform(k3, (NCLS, C), jnp.float32, -0.08, 0.08)
    b2 = jax.random.uniform(k4, (NCLS, 1), jnp.float32, -0.08, 0.08)

    # Pack once (not per forward call).
    params = jax.block_until_ready(pack_params(w1, b1, w2, b2))

    out = basecall_forward(x, params)
    out = jax.block_until_ready(out)

    ref = _reference_forward(x, w1, b1, w2, b2)
    assert out.shape == (B, NCLS, L)
    assert jnp.allclose(out, ref, atol=1e-3, rtol=1e-3), "kernel/reference mismatch"

    print("KERNEL_OK")
</pallas_src>

<mosaic_0001>
module attributes {stable_mosaic.version = 11 : i64} {
  func.func @_basecall_kernel(%arg0: memref<1x512xf32, #tpu.memory_space<vmem>>, %arg1: memref<40x33xf32, #tpu.memory_space<vmem>>, %arg2: memref<2x8x256xf32, #tpu.memory_space<vmem>>) attributes {dimension_semantics = [], scalar_prefetch = 0 : i64, scratch_operands = 0 : i64, tpu.core_type = #tpu.core_type<tc>} {
    %c0 = arith.constant 0 : index
    %c0_0 = arith.constant 0 : index
    %0 = vector.load %arg0[%c0, %c0_0] : memref<1x512xf32, #tpu.memory_space<vmem>>, vector<1x512xf32>
    %1 = tpu.iota {dimensions = array<i32: 1>} : vector<1x512xi32>
    %c256_i32 = arith.constant 256 : i32
    %c0_i32 = arith.constant 0 : i32
    %2 = arith.cmpi eq, %c256_i32, %c0_i32 : i32
    %c1_i32 = arith.constant 1 : i32
    %3 = arith.select %2, %c1_i32, %c256_i32 : i32
    %4 = vector.broadcast %3 : i32 to vector<1x512xi32>
    %5 = arith.remsi %1, %4 : vector<1x512xi32>
    %c0_i32_1 = arith.constant 0 : i32
    %6 = vector.broadcast %c0_i32_1 : i32 to vector<1x512xi32>
    %7 = arith.cmpi ne, %5, %6 : vector<1x512xi32>
    %c0_i32_2 = arith.constant 0 : i32
    %8 = vector.broadcast %c0_i32_2 : i32 to vector<1x512xi32>
    %9 = arith.cmpi slt, %5, %8 : vector<1x512xi32>
    %c0_i32_3 = arith.constant 0 : i32
    %10 = arith.cmpi slt, %3, %c0_i32_3 : i32
    %11 = vector.broadcast %10 : i1 to vector<1x512xi1>
    %12 = vector.broadcast %11 : vector<1x512xi1> to vector<1x512xi1>
    %13 = arith.xori %9, %12 : vector<1x512xi1>
    %14 = arith.andi %13, %7 : vector<1x512xi1>
    %15 = vector.broadcast %3 : i32 to vector<1x512xi32>
    %16 = arith.addi %5, %15 : vector<1x512xi32>
    %17 = arith.select %14, %16, %5 : vector<1x512xi1>, vector<1x512xi32>
    %c2_i32 = arith.constant 2 : i32
    %18 = tpu.dynamic_rotate %0 by %c2_i32 dim 1 : vector<1x512xf32>, i32 -> vector<1x512xf32>
    %c2_i32_4 = arith.constant 2 : i32
    %19 = vector.broadcast %c2_i32_4 : i32 to vector<1x512xi32>
    %20 = arith.cmpi sge, %17, %19 : vector<1x512xi32>
    %cst = arith.constant 0.000000e+00 : f32
    %21 = vector.broadcast %cst : f32 to vector<1x512xf32>
    %22 = arith.select %20, %18, %21 : vector<1x512xi1>, vector<1x512xf32>
    %c0_5 = arith.constant 0 : index
    %c0_6 = arith.constant 0 : index
    %23 = vector.load %arg1[%c0_5, %c0_6] : memref<40x33xf32, #tpu.memory_space<vmem>>, vector<32x1xf32>
    %24 = vector.broadcast %23 : vector<32x1xf32> to vector<32x512xf32>
    %25 = vector.broadcast %22 : vector<1x512xf32> to vector<32x512xf32>
    %26 = arith.mulf %24, %25 : vector<32x512xf32>
    %c1_i32_7 = arith.constant 1 : i32
    %27 = tpu.dynamic_rotate %0 by %c1_i32_7 dim 1 : vector<1x512xf32>, i32 -> vector<1x512xf32>
    %c1_i32_8 = arith.constant 1 : i32
    %28 = vector.broadcast %c1_i32_8 : i32 to vector<1x512xi32>
    %29 = arith.cmpi sge, %17, %28 : vector<1x512xi32>
    %cst_9 = arith.constant 0.000000e+00 : f32
    %30 = vector.broadcast %cst_9 : f32 to vector<1x512xf32>
    %31 = arith.select %29, %27, %30 : vector<1x512xi1>, vector<1x512xf32>
    %c0_10 = arith.constant 0 : index
    %c1 = arith.constant 1 : index
    %32 = vector.load %arg1[%c0_10, %c1] : memref<40x33xf32, #tpu.memory_space<vmem>>, vector<32x1xf32>
    %33 = vector.broadcast %32 : vector<32x1xf32> to vector<32x512xf32>
    %34 = vector.broadcast %31 : vector<1x512xf32> to vector<32x512xf32>
    %35 = arith.mulf %33, %34 : vector<32x512xf32>
    %36 = arith.addf %26, %35 : vector<32x512xf32>
    %c0_11 = arith.constant 0 : index
    %c2 = arith.constant 2 : index
    %37 = vector.load %arg1[%c0_11, %c2] : memref<40x33xf32, #tpu.memory_space<vmem>>, vector<32x1xf32>
    %38 = vector.broadcast %37 : vector<32x1xf32> to vector<32x512xf32>
    %39 = vector.broadcast %0 : vector<1x512xf32> to vector<32x512xf32>
    %40 = arith.mulf %38, %39 : vector<32x512xf32>
    %41 = arith.addf %36, %40 : vector<32x512xf32>
    %c511_i32 = arith.constant 511 : i32
    %42 = tpu.dynamic_rotate %0 by %c511_i32 dim 1 : vector<1x512xf32>, i32 -> vector<1x512xf32>
    %c255_i32 = arith.constant 255 : i32
    %43 = vector.broadcast %c255_i32 : i32 to vector<1x512xi32>
    %44 = arith.cmpi slt, %17, %43 : vector<1x512xi32>
    %cst_12 = arith.constant 0.000000e+00 : f32
    %45 = vector.broadcast %cst_12 : f32 to vector<1x512xf32>
    %46 = arith.select %44, %42, %45 : vector<1x512xi1>, vector<1x512xf32>
    %c0_13 = arith.constant 0 : index
    %c3 = arith.constant 3 : index
    %47 = vector.load %arg1[%c0_13, %c3] : memref<40x33xf32, #tpu.memory_space<vmem>>, vector<32x1xf32>
    %48 = vector.broadcast %47 : vector<32x1xf32> to vector<32x512xf32>
    %49 = vector.broadcast %46 : vector<1x512xf32> to vector<32x512xf32>
    %50 = arith.mulf %48, %49 : vector<32x512xf32>
    %51 = arith.addf %41, %50 : vector<32x512xf32>
    %c510_i32 = arith.constant 510 : i32
    %52 = tpu.dynamic_rotate %0 by %c510_i32 dim 1 : vector<1x512xf32>, i32 -> vector<1x512xf32>
    %c254_i32 = arith.constant 254 : i32
    %53 = vector.broadcast %c254_i32 : i32 to vector<1x512xi32>
    %54 = arith.cmpi slt, %17, %53 : vector<1x512xi32>
    %cst_14 = arith.constant 0.000000e+00 : f32
    %55 = vector.broadcast %cst_14 : f32 to vector<1x512xf32>
    %56 = arith.select %54, %52, %55 : vector<1x512xi1>, vector<1x512xf32>
    %c0_15 = arith.constant 0 : index
    %c4 = arith.constant 4 : index
    %57 = vector.load %arg1[%c0_15, %c4] : memref<40x33xf32, #tpu.memory_space<vmem>>, vector<32x1xf32>
    %58 = vector.broadcast %57 : vector<32x1xf32> to vector<32x512xf32>
    %59 = vector.broadcast %56 : vector<1x512xf32> to vector<32x512xf32>
    %60 = arith.mulf %58, %59 : vector<32x512xf32>
    %61 = arith.addf %51, %60 : vector<32x512xf32>
    %c0_16 = arith.constant 0 : index
    %c5 = arith.constant 5 : index
    %62 = vector.load %arg1[%c0_16, %c5] : memref<40x33xf32, #tpu.memory_space<vmem>>, vector<32x1xf32>
    %63 = vector.broadcast %62 : vector<32x1xf32> to vector<32x512xf32>
    %64 = arith.addf %61, %63 : vector<32x512xf32>
    %cst_17 = arith.constant 0.000000e+00 : f32
    %65 = vector.broadcast %cst_17 : f32 to vector<32x512xf32>
    %66 = arith.maximumf %64, %65 : vector<32x512xf32>
    %c32 = arith.constant 32 : index
    %c0_18 = arith.constant 0 : index
    %67 = vector.load %arg1[%c32, %c0_18] : memref<40x33xf32, #tpu.memory_space<vmem>>, vector<8x32xf32>
    %cst_19 = arith.constant dense<0.000000e+00> : vector<8x512xf32>
    %68 = tpu.matmul %67, %66, %cst_19 {dimension_numbers = #tpu.dot_dimension_numbers<[1], [0], [0], [1], [0, 0, 1, 1], [], []>} : vector<8x32xf32>, vector<32x512xf32>, vector<8x512xf32> -> vector<8x512xf32>
    %c32_20 = arith.constant 32 : index
    %c32_21 = arith.constant 32 : index
    %69 = vector.load %arg1[%c32_20, %c32_21] : memref<40x33xf32, #tpu.memory_space<vmem>>, vector<8x1xf32>
    %70 = vector.broadcast %69 : vector<8x1xf32> to vector<8x512xf32>
    %71 = arith.addf %68, %70 : vector<8x512xf32>
    %cst_22 = arith.constant dense<0xFF800000> : vector<512xf32>
    %72 = vector.multi_reduction <maximumf>, %71, %cst_22 [0] : vector<8x512xf32> to vector<512xf32>
    %73 = vector.shape_cast %72 : vector<512xf32> to vector<1x512xf32>
    %74 = vector.broadcast %73 : vector<1x512xf32> to vector<8x512xf32>
    %75 = arith.subf %71, %74 : vector<8x512xf32>
    %76 = math.exp %75 : vector<8x512xf32>
    %cst_23 = arith.constant dense<0.000000e+00> : vector<512xf32>
    %77 = vector.multi_reduction <add>, %76, %cst_23 [0] : vector<8x512xf32> to vector<512xf32>
    %78 = vector.shape_cast %77 : vector<512xf32> to vector<1x512xf32>
    %79 = math.log %78 : vector<1x512xf32>
    %80 = vector.broadcast %79 : vector<1x512xf32> to vector<8x512xf32>
    %81 = arith.subf %75, %80 : vector<8x512xf32>
    %82 = vector.extract_strided_slice %81 {offsets = [0, 0], sizes = [8, 256], strides = [1, 1]} : vector<8x512xf32> to vector<8x256xf32>
    %c0_24 = arith.constant 0 : index
    %c0_25 = arith.constant 0 : index
    %c0_26 = arith.constant 0 : index
    %83 = vector.load %arg2[%c0_24, %c0_25, %c0_26] : memref<2x8x256xf32, #tpu.memory_space<vmem>>, vector<1x8x256xf32>
    %84 = vector.shape_cast %83 : vector<1x8x256xf32> to vector<8x256xf32>
    %85 = vector.shape_cast %82 : vector<8x256xf32> to vector<1x8x256xf32>
    tpu.vector_store %arg2[%c0_24, %c0_25, %c0_26], %85 {strides = array<i32>} : memref<2x8x256xf32, #tpu.memory_space<vmem>>, vector<1x8x256xf32>,
    %86 = vector.extract_strided_slice %81 {offsets = [0, 256], sizes = [8, 256], strides = [1, 1]} : vector<8x512xf32> to vector<8x256xf32>
    %c1_27 = arith.constant 1 : index
    %c0_28 = arith.constant 0 : index
    %c0_29 = arith.constant 0 : index
    %87 = vector.load %arg2[%c1_27, %c0_28, %c0_29] : memref<2x8x256xf32, #tpu.memory_space<vmem>>, vector<1x8x256xf32>
    %88 = vector.shape_cast %87 : vector<1x8x256xf32> to vector<8x256xf32>
    %89 = vector.shape_cast %86 : vector<8x256xf32> to vector<1x8x256xf32>
    tpu.vector_store %arg2[%c1_27, %c0_28, %c0_29], %89 {strides = array<i32>} : memref<2x8x256xf32, #tpu.memory_space<vmem>>, vector<1x8x256xf32>,
    return
  }
}

</mosaic_0001>

<bundles_post_ra>
// kernel: basecall_forward.1
= control target key start
LH: loop header
LB: loop body
LE: loop exit
PB: predicated region body
PF: predicated region fallthrough
CT: control target
= control target key end

     0   :  { %7 = vsyncpa [#allocation3], 0  ;;  %s725_s12 = smov [#allocation2]   ;;  %s726_s14 = smov 128   ;;  %s1079_s0 = inlined_call_operand.vmem [shape: f32[1,512], index: 0, kind: input, shape index: {}]   ;;  %s1080_s1 = inlined_call_operand.hbm [shape: f32[40,33], index: 1, kind: input, shape index: {}]   ;;  %s1081_s2 = inlined_call_operand.vmem [shape: f32[2,8,256], index: 2, kind: output, shape index: {}]  }
   0x1   :  { %s14_s11 = sshll.u32 %s1080_s1, 4  ;;  %s16_s13 = sshll.u32 %s725_s12, 4  ;;  %s15_s11 = int_to_ptr.hbm [resolvable:$true] %s14_s11  ;;  %s17_s13 = int_to_ptr.vmem [resolvable:$true] %s16_s13 }
   0x2   :  { %s727_s15 = smov 8  }
   0x3   :  { %22 = dma.hbm_to_vmem [thread:$0]  %s15_s11, 640, %s17_s13, [#allocation3], %s726_s14, %s726_s14, %s727_s15  }
   0x4   :  { %723 = dma.done.wait [#allocation3], 640  }
   0x5   :  { %724 = vsyncadd [#allocation3], 4294966656  ;;  %v728_v0 = vmov 1   ;;  %v729_v1 = vmov 0   ;;  %v27_v2 = vld [vmem:[%s1079_s0] sm:$0xf]  ;;  %v28_v18 = vlaneseq }
   0x6   :  { %662 = vset.pattern.permute.xlu1 %v728_v0  ;;  %661 = vset.pattern.permute.xlu0 %v729_v1  ;;  %v760_v3 = vperm.slane %v27_v2, 3  ;;  %v762_v4 = vperm.slane %v27_v2, 1  ;;  %s730_s1 = smov 2   ;;  %s731_s18 = smov 1   ;;  %v732_v5 = vmov 2   ;;  %v767_v6 = vperm.slane %v27_v2, 2 }
   0x7   :  { %667 = vset.pattern.permute.xlu2 %v732_v5  ;;  %v772_v7 = vperm.slane %v27_v2, 0  ;;  %v114_v8 = vld [vmem:[#allocation2 + $0x18] sm:$0xff]  ;;  %s733_s0 = smov 127   ;;  %v113_v9 = vld [vmem:[#allocation2 + $0x10] sm:$0xff]  ;;  %v112_v10 = vld [vmem:[#allocation2 + $0x8] sm:$0xff]  ;;  %s734_s19 = smov 126  }
   0x8   :  { %96 = vrot.lane.b32.xlu2 %v760_v3, %s730_s1  ;;  %157 = vrot.lane.b32.xlu1 %v762_v4, %s731_s18  ;;  %v111_v11 = vld [vmem:[#allocation2] sm:$0xff]  ;;  %v735_v12 = vmov 3   ;;  %v736_v13 = vmov 4   ;;  %v737_v14 = vmov 5   ;;  %v794_v19 = vand.u32 127, %v28_v18 }
   0x9   :  { %92 = vrot.lane.b32.xlu0 %v762_v4, %s730_s1  ;;  %vm476_vm12 = vcmask 261120  }
   0xa   :  { %v31_v23 = vadd.s32 256, %v794_v19  ;;  %v37_v24 = vand.u32 255, %v794_v19  ;;  %vm163_vm0 = vcmp.lt.s32.totalorder %v794_v19, 1  ;;  %vm98_vm3 = vcmp.lt.s32.totalorder %v794_v19, 2 }
   0xb   :  { %vm284_vm4 = vcmp.lt.s32.totalorder %v794_v19, 127  ;;  %vm357_vm9 = vcmp.lt.s32.totalorder %v794_v19, 126 }
   0xc   :  { %v51_v25 = vand.u32 255, %v31_v23  ;;  %vm168_vm1 = vcmp.ge.s32.totalorder %v37_v24, 1  ;;  %vm103_vm5 = vcmp.ge.s32.totalorder %v37_v24, 2 }
   0xe   :  { %vm170_vm2 = vcmp.ge.s32.totalorder %v51_v25, 1  ;;  %vm105_vm6 = vcmp.ge.s32.totalorder %v51_v25, 2 }
  0x10   :  { %161 = vrot.lane.b32.xlu2 %v760_v3, %s731_s18  ;;  %159 = vrot.lane.b32.xlu1 %v767_v6, %s731_s18 }
  0x11   :  { %94 = vrot.lane.b32.xlu0 %v767_v6, %s730_s1 }
  0x18   :  { %189 = vperm.xlu1 %662, %v114_v8   ;;  %276 = vrot.lane.b32.xlu2 %v772_v7, %s733_s0 }
  0x19   :  { %132 = vperm.xlu0 %661, %v114_v8  }
  0x20   :  { %282 = vrot.lane.b32.xlu1 %v760_v3, %s733_s0  ;;  %280 = vrot.lane.b32.xlu2 %v767_v6, %s733_s0 }
  0x21   :  { %90 = vrot.lane.b32.xlu0 %v772_v7, %s730_s1  ;;  %663 = vset.pattern.permute.xlu1 %v729_v1 }
  0x28   :  { %127 = vperm.xlu1 %663, %v113_v9   ;;  %155 = vrot.lane.b32.xlu2 %v772_v7, %s731_s18 }
  0x29   :  { %122 = vperm.xlu0 %661, %v112_v10  }
  0x30   :  { %664 = vset.pattern.permute.xlu1 %v732_v5  ;;  %349 = vrot.lane.b32.xlu2 %v772_v7, %s734_s19 }
  0x31   :  { %665 = vset.pattern.permute.xlu0 %v728_v0  ;;  %241 = vperm.xlu1 %664, %v114_v8  }
  0x32   :  { %185 = vperm.xlu0 %665, %v113_v9  }
  0x38   :  { %353 = vrot.lane.b32.xlu2 %v767_v6, %s734_s19 }
  0x39   :  { %355 = vrot.lane.b32.xlu1 %v760_v3, %s734_s19 }
  0x3a   :  { %177 = vperm.xlu0 %665, %v111_v11   ;;  %666 = vset.pattern.permute.xlu1 %v728_v0 }
  0x40   :  { %237 = vperm.xlu2 %667, %v113_v9  }
  0x41   :  { %181 = vperm.xlu1 %666, %v112_v10  }
  0x42   :  { %673 = vset.pattern.permute.xlu0 %v732_v5 }
  0x43   :  { %229 = vperm.xlu0 %673, %v111_v11  }
  0x48   :  { %669 = vset.pattern.permute.xlu2 %v729_v1 }
  0x49   :  { %668 = vset.pattern.permute.xlu1 %v735_v12  ;;  %117 = vperm.xlu2 %669, %v111_v11  }
  0x4a   :  { %310 = vperm.xlu1 %668, %v114_v8  }
  0x4b   :  { %676 = vset.pattern.permute.xlu0 %v736_v13 }
  0x4c   :  { %375 = vperm.xlu0 %676, %v112_v10  }
  0x51   :  { %278 = vrot.lane.b32.xlu2 %v762_v4, %s733_s0 }
  0x52   :  { %670 = vset.pattern.permute.xlu1 %v732_v5  ;;  %672 = vset.pattern.permute.xlu2 %v736_v13 }
  0x53   :  { %233 = vperm.xlu1 %670, %v112_v10  }
  0x54   :  { %680 = vset.pattern.permute.xlu0 %v737_v14 }
  0x55   :  { %423 = vperm.xlu0 %680, %v111_v11  }
  0x59   :  { %383 = vperm.xlu2 %672, %v114_v8  }
  0x5b   :  { %671 = vset.pattern.permute.xlu1 %v735_v12 }
  0x5c   :  { %306 = vperm.xlu1 %671, %v113_v9  }
  0x61   :  { %351 = vrot.lane.b32.xlu2 %v762_v4, %s734_s19 }
  0x62   :  { %v97_v15 = vpop.permute.xlu2 %96  ;;  %675 = vset.pattern.permute.xlu2 %v735_v12 }
  0x64   :  { %302 = vperm.xlu1 %671, %v112_v10  }
  0x69   :  { %298 = vperm.xlu2 %675, %v111_v11  }
  0x6a   :  { %v162_v16 = vpop.permute.xlu2 %161 }
  0x6c   :  { %674 = vset.pattern.permute.xlu1 %v736_v13 }
  0x6d   :  { %379 = vperm.xlu1 %674, %v113_v9  }
  0x71   :  { %678 = vset.pattern.permute.xlu2 %v736_v13 }
  0x72   :  { %371 = vperm.xlu2 %678, %v111_v11   ;;  %v792_v17 = vpop.permute.xlu2 %276 }
  0x75   :  { %677 = vset.pattern.permute.xlu1 %v737_v14 }
  0x76   :  { %435 = vperm.xlu1 %677, %v114_v8  }
  0x7a   :  { %v158_v20 = vpop.permute.xlu1 %157  ;;  %v796_v21 = vpop.permute.xlu2 %280  ;;  %679 = vset.pattern.permute.xlu2 %v737_v14 }
  0x7b   :  { %v93_v22 = vpop.permute.xlu0 %92  ;;  %427 = vperm.xlu2 %679, %v112_v10  }
  0x7e   :  { %431 = vperm.xlu1 %677, %v113_v9  }
  0x82   :  { %v160_v26 = vpop.permute.xlu1 %159  ;;  %v156_v27 = vpop.permute.xlu2 %155 }
  0x83   :  { %v164_v28 = vsel %vm163_vm0, %v160_v26, %v162_v16  ;;  %v165_v29 = vsel %vm163_vm0, %v158_v20, %v160_v26  ;;  %v95_v30 = vpop.permute.xlu0 %94  ;;  %v167_v31 = vsel %vm163_vm0, %v162_v16, %v156_v27  ;;  %v166_v34 = vsel %vm163_vm0, %v156_v27, %v158_v20 }
  0x84   :  { %v172_v32 = vsel %vm168_vm1, %v167_v31, 0.0  ;;  %v174_v33 = vsel %vm170_vm2, %v165_v29, 0.0  ;;  %v99_v35 = vsel %vm98_vm3, %v95_v30, %v97_v15  ;;  %v808_v38 = vperm.slane %v164_v28, 0 }
  0x85   :  { %v804_v36 = vperm.slane %v172_v32, 0  ;;  %v806_v37 = vperm.slane %v174_v33, 0  ;;  %v810_v39 = vperm.slane %v166_v34, 0  ;;  %v138_v40 = vperm.slane %v99_v35, 0 }
  0x86   :  { %v100_v1 = vsel %vm98_vm3, %v93_v22, %v95_v30  ;;  %v875_v31 = vadd.s32 128, %v794_v19  ;;  %v878_v32 = vadd.s32 384, %v794_v19 }
  0x87   :  { %v109_v2 = vsel %vm105_vm6, %v100_v1, 0.0 }
  0x88   :  { %v853_v8 = vperm.slane %v109_v2, 0 }
  0x8a   :  { %v190_v41 = vpop.permute.xlu1 %189  ;;  %v812_v42 = vpop.permute.xlu2 %349 }
  0x8b   :  { %v208_v43 = vmul.f32 %v804_v36, %v190_v41  ;;  %v816_v44 = vmul.f32 %v810_v39, %v190_v41  ;;  %v819_v45 = vmul.f32 %v806_v37, %v190_v41  ;;  %v211_v46 = vmul.f32 %v808_v38, %v190_v41  ;;  %v822_v47 = vpop.permute.xlu0 %132 }
  0x8c   :  { %v154_v48 = vmul.f32 %v138_v40, %v822_v47 }
  0x8e   :  { %v825_v49 = vadd.f32 %v211_v46, %v154_v48  ;;  %v58_v46 = vand.u32 255, %v878_v32 }
  0x90   :  { %vm904_vm8 = vcmp.lt.s32.totalorder %v58_v46, 255  ;;  %vm365_vm11 = vcmp.lt.s32.totalorder %v58_v46, 254 }
  0x92   :  { %v283_v50 = vpop.permute.xlu1 %282  ;;  %v828_v51 = vpop.permute.xlu2 %353 }
  0x93   :  { %v833_v52 = vsel %vm284_vm4, %v796_v21, %v283_v50  ;;  %v838_v53 = vsel %vm284_vm4, %v283_v50, %v792_v17  ;;  %v91_v54 = vpop.permute.xlu0 %90 }
  0x94   :  { %v102_v55 = vsel %vm98_vm3, %v97_v15, %v91_v54  ;;  %v101_v5 = vsel %vm98_vm3, %v91_v54, %v93_v22  ;;  %v296_v2 = vsel %vm904_vm8, %v838_v53, 0.0 }
  0x95   :  { %v107_v56 = vsel %vm103_vm5, %v102_v55, 0.0  ;;  %v855_v9 = vperm.slane %v101_v5, 0  ;;  %v938_v53 = vperm.slane %v296_v2, 0 }
  0x96   :  { %v135_v57 = vperm.slane %v107_v56, 0 }
  0x98   :  { %v151_v58 = vmul.f32 %v135_v57, %v822_v47 }
  0x9a   :  { %v128_v59 = vpop.permute.xlu1 %127  ;;  %v843_v60 = vpop.permute.xlu2 %237  ;;  %v845_v61 = vadd.f32 %v208_v43, %v151_v58  ;;  %v44_v43 = vand.u32 255, %v875_v31 }
  0x9b   :  { %v147_v62 = vmul.f32 %v135_v57, %v128_v59  ;;  %v150_v63 = vmul.f32 %v138_v40, %v128_v59  ;;  %v847_v0 = vpop.permute.xlu0 %122  ;;  %v148_v12 = vmul.f32 %v855_v9, %v128_v59  ;;  %v149_v13 = vmul.f32 %v853_v8, %v128_v59 }
  0x9c   :  { %v143_v54 = vmul.f32 %v135_v57, %v847_v0  ;;  %v146_v55 = vmul.f32 %v138_v40, %v847_v0  ;;  %vm895_vm7 = vcmp.lt.s32.totalorder %v44_v43, 255  ;;  %vm1020_vm10 = vcmp.lt.s32.totalorder %v44_v43, 254 }
  0xa3   :  { %v242_v10 = vpop.permute.xlu1 %241  ;;  %v118_v11 = vpop.permute.xlu2 %117 }
  0xa4   :  { %v186_v14 = vpop.permute.xlu0 %185  ;;  %v139_v29 = vmul.f32 %v135_v57, %v118_v11  ;;  %v142_v33 = vmul.f32 %v138_v40, %v118_v11  ;;  %v256_v5 = vmul.f32 %v242_v10, %v772_v7 }
  0xa5   :  { %v204_v15 = vmul.f32 %v804_v36, %v186_v14  ;;  %v205_v16 = vmul.f32 %v810_v39, %v186_v14  ;;  %v206_v18 = vmul.f32 %v806_v37, %v186_v14  ;;  %v207_v20 = vmul.f32 %v808_v38, %v186_v14 }
  0xa7   :  { %v863_v22 = vadd.f32 %v204_v15, %v147_v62  ;;  %v865_v23 = vadd.f32 %v205_v16, %v148_v12  ;;  %v867_v24 = vadd.f32 %v206_v18, %v149_v13  ;;  %v869_v25 = vadd.f32 %v207_v20, %v150_v63 }
  0xa8   :  { %v152_v63 = vmul.f32 %v855_v9, %v822_v47  ;;  %v257_v12 = vmul.f32 %v242_v10, %v762_v4  ;;  %v258_v13 = vmul.f32 %v242_v10, %v767_v6  ;;  %v936_v18 = vperm.slane %v833_v52, 0 }
  0xa9   :  { %v140_v20 = vmul.f32 %v855_v9, %v118_v11 }
  0xab   :  { %v871_v26 = vpop.permute.xlu1 %355  ;;  %v279_v27 = vpop.permute.xlu2 %278 }
  0xac   :  { %v178_v28 = vpop.permute.xlu0 %177  ;;  %v286_v62 = vsel %vm284_vm4, %v279_v27, %v796_v21  ;;  %v287_v21 = vsel %vm284_vm4, %v792_v17, %v279_v27  ;;  %v361_v43 = vsel %vm357_vm9, %v871_v26, %v812_v42  ;;  %v358_v32 = vsel %vm357_vm9, %v828_v51, %v871_v26 }
  0xad   :  { %v196_v30 = vmul.f32 %v804_v36, %v178_v28  ;;  %v199_v34 = vmul.f32 %v808_v38, %v178_v28  ;;  %v294_v1 = vsel %vm895_vm7, %v286_v62, 0.0  ;;  %v929_v15 = vperm.slane %v287_v21, 0 }
  0xae   :  { %v931_v17 = vperm.slane %v294_v1, 0  ;;  %v198_v59 = vmul.f32 %v806_v37, %v178_v28  ;;  %v369_v46 = vsel %vm365_vm11, %v361_v43, 0.0 }
  0xaf   :  { %v212_v35 = vadd.f32 %v196_v30, %v139_v29  ;;  %v215_v41 = vadd.f32 %v199_v34, %v142_v33  ;;  %v225_v29 = vadd.f32 %v816_v44, %v152_v63  ;;  %v272_v34 = vadd.f32 %v256_v5, %v845_v61 }
  0xb3   :  { %v883_v48 = vpop.permute.xlu1 %181  ;;  %v885_v50 = vpop.permute.xlu2 %383 }
  0xb4   :  { %v200_v56 = vmul.f32 %v804_v36, %v883_v48  ;;  %v203_v58 = vmul.f32 %v808_v38, %v883_v48  ;;  %v153_v38 = vmul.f32 %v853_v8, %v822_v47  ;;  %v259_v47 = vmul.f32 %v242_v10, %v760_v3 }
  0xb5   :  { %v230_v30 = vpop.permute.xlu0 %229 }
  0xb6   :  { %v908_v36 = vadd.f32 %v200_v56, %v143_v54  ;;  %v910_v57 = vadd.f32 %v203_v58, %v146_v55  ;;  %v226_v14 = vadd.f32 %v819_v45, %v153_v38  ;;  %v141_v45 = vmul.f32 %v853_v8, %v118_v11 }
  0xb7   :  { %v273_v55 = vadd.f32 %v257_v12, %v225_v29  ;;  %v197_v58 = vmul.f32 %v810_v39, %v178_v28  ;;  %v275_v11 = vadd.f32 %v259_v47, %v825_v49  ;;  %v244_v62 = vmul.f32 %v230_v30, %v772_v7 }
  0xb8   :  { %v274_v56 = vadd.f32 %v258_v13, %v226_v14  ;;  %v245_v40 = vmul.f32 %v230_v30, %v762_v4  ;;  %v246_v61 = vmul.f32 %v230_v30, %v767_v6  ;;  %v247_v63 = vmul.f32 %v230_v30, %v760_v3 }
  0xb9   :  { %v213_v2 = vadd.f32 %v197_v58, %v140_v20  ;;  %v214_v28 = vadd.f32 %v198_v59, %v141_v45  ;;  %v260_v47 = vadd.f32 %v244_v62, %v212_v35  ;;  %v254_v35 = vmul.f32 %v843_v60, %v767_v6 }
  0xbb   :  { %v933_v16 = vpop.permute.xlu2 %351  ;;  %v262_v29 = vadd.f32 %v246_v61, %v214_v28  ;;  %v270_v59 = vadd.f32 %v254_v35, %v867_v24  ;;  %v202_v24 = vmul.f32 %v806_v37, %v883_v48  ;;  %v389_v35 = vperm.slane %v369_v46, 0 }
  0xbc   :  { %v311_v27 = vpop.permute.xlu1 %310 }
  0xbd   :  { %v329_v10 = vmul.f32 %v929_v15, %v311_v27  ;;  %v330_v33 = vmul.f32 %v931_v17, %v311_v27  ;;  %v331_v54 = vmul.f32 %v936_v18, %v311_v27  ;;  %v332_v52 = vmul.f32 %v938_v53, %v311_v27 }
  0xbe   :  { %v261_v27 = vadd.f32 %v245_v40, %v213_v2 }
  0xbf   :  { %v950_v44 = vadd.f32 %v329_v10, %v272_v34  ;;  %v955_v38 = vadd.f32 %v330_v33, %v273_v55  ;;  %v959_v21 = vadd.f32 %v331_v54, %v274_v56  ;;  %v961_v1 = vadd.f32 %v332_v52, %v275_v11 }
  0xc0   :  { %v263_v10 = vadd.f32 %v247_v63, %v215_v41  ;;  %v252_v54 = vmul.f32 %v843_v60, %v772_v7  ;;  %v253_v52 = vmul.f32 %v843_v60, %v762_v4  ;;  %v255_v41 = vmul.f32 %v843_v60, %v760_v3 }
  0xc1   :  { %v144_v60 = vmul.f32 %v855_v9, %v847_v0 }
  0xc2   :  { %v268_v56 = vadd.f32 %v252_v54, %v863_v22  ;;  %v269_v58 = vadd.f32 %v253_v52, %v865_v23  ;;  %v271_v11 = vadd.f32 %v255_v41, %v869_v25  ;;  %v145_v22 = vmul.f32 %v853_v8, %v847_v0  ;;  %v376_v41 = vpop.permute.xlu0 %375 }
  0xc3   :  { %v299_v5 = vpop.permute.xlu2 %298  ;;  %v201_v23 = vmul.f32 %v810_v39, %v883_v48  ;;  %v388_v52 = vperm.slane %v358_v32, 0 }
  0xc4   :  { %v317_v12 = vmul.f32 %v929_v15, %v299_v5  ;;  %v318_v49 = vmul.f32 %v931_v17, %v299_v5  ;;  %v319_v13 = vmul.f32 %v936_v18, %v299_v5  ;;  %v320_v14 = vmul.f32 %v938_v53, %v299_v5 }
  0xc5   :  { %v234_v30 = vpop.permute.xlu1 %233  ;;  %v217_v39 = vadd.f32 %v201_v23, %v144_v60 }
  0xc6   :  { %v967_v33 = vadd.f32 %v317_v12, %v260_v47  ;;  %v969_v34 = vadd.f32 %v318_v49, %v261_v27  ;;  %v971_v20 = vadd.f32 %v319_v13, %v262_v29  ;;  %v973_v45 = vadd.f32 %v320_v14, %v263_v10 }
  0xc7   :  { %v248_v12 = vmul.f32 %v234_v30, %v772_v7  ;;  %v249_v9 = vmul.f32 %v234_v30, %v762_v4  ;;  %v250_v0 = vmul.f32 %v234_v30, %v767_v6  ;;  %v251_v8 = vmul.f32 %v234_v30, %v760_v3 }
  0xc8   :  { %v218_v49 = vadd.f32 %v202_v24, %v145_v22 }
  0xc9   :  { %v264_v37 = vadd.f32 %v248_v12, %v908_v36  ;;  %v265_v48 = vadd.f32 %v249_v9, %v217_v39  ;;  %v267_v14 = vadd.f32 %v251_v8, %v910_v57  ;;  %v359_v36 = vsel %vm357_vm9, %v933_v16, %v828_v51 }
  0xca   :  { %v266_v13 = vadd.f32 %v250_v0, %v218_v49  ;;  %v367_v31 = vsel %vm1020_vm10, %v359_v36, 0.0  ;;  %v424_v3 = vpop.permute.xlu0 %423 }
  0xce   :  { %v307_v55 = vpop.permute.xlu1 %306 }
  0xcf   :  { %v325_v62 = vmul.f32 %v929_v15, %v307_v55  ;;  %v326_v40 = vmul.f32 %v931_v17, %v307_v55  ;;  %v327_v61 = vmul.f32 %v936_v18, %v307_v55  ;;  %v328_v63 = vmul.f32 %v938_v53, %v307_v55 }
  0xd1   :  { %v999_v25 = vadd.f32 %v325_v62, %v268_v56  ;;  %v1001_v2 = vadd.f32 %v326_v40, %v269_v58  ;;  %v1003_v28 = vadd.f32 %v327_v61, %v270_v59  ;;  %v1005_v5 = vadd.f32 %v328_v63, %v271_v11  ;;  %v372_v56 = vpop.permute.xlu2 %371 }
  0xd2   :  { %v404_v58 = vmul.f32 %v388_v52, %v885_v50  ;;  %v405_v59 = vmul.f32 %v389_v35, %v885_v50  ;;  %v396_v62 = vmul.f32 %v388_v52, %v376_v41  ;;  %v397_v63 = vmul.f32 %v389_v35, %v376_v41 }
  0xd4   :  { %v420_v51 = vadd.f32 %v404_v58, %v959_v21  ;;  %v421_v26 = vadd.f32 %v405_v59, %v961_v1  ;;  %v392_v21 = vmul.f32 %v388_v52, %v372_v56 }
  0xd6   :  { %v303_v47 = vpop.permute.xlu1 %302 }
  0xd7   :  { %v321_v27 = vmul.f32 %v929_v15, %v303_v47  ;;  %v322_v7 = vmul.f32 %v931_v17, %v303_v47  ;;  %v323_v4 = vmul.f32 %v936_v18, %v303_v47  ;;  %v324_v6 = vmul.f32 %v938_v53, %v303_v47  ;;  %v1040_v18 = vld [vmem:[#allocation2 + $0x20] sm:$0xff] }
  0xd8   :  { %v360_v17 = vsel %vm357_vm9, %v812_v42, %v933_v16  ;;  %v738_v53 = vmov 32   ;;  %v387_v16 = vperm.slane %v367_v31, 0 }
  0xd9   :  { %v337_v57 = vadd.f32 %v321_v27, %v264_v37  ;;  %v338_v29 = vadd.f32 %v322_v7, %v265_v48  ;;  %v339_v15 = vadd.f32 %v323_v4, %v266_v13  ;;  %v340_v10 = vadd.f32 %v324_v6, %v267_v14  ;;  %681 = vset.pattern.permute.xlu1 %v738_v53  ;;  %v428_v47 = vpop.permute.xlu2 %427 }
  0xda   :  { %473 = vperm.xlu1 %681, %v1040_v18   ;;  %682 = vset.pattern.permute.xlu0 %v738_v53  ;;  %v386_v30 = vperm.slane %v360_v17, 0  ;;  %v403_v55 = vmul.f32 %v387_v16, %v885_v50  ;;  %v395_v61 = vmul.f32 %v387_v16, %v376_v41  ;;  %v391_v22 = vmul.f32 %v387_v16, %v372_v56 }
  0xdb   :  { %v393_v13 = vmul.f32 %v389_v35, %v372_v56  ;;  %v412_v7 = vadd.f32 %v396_v62, %v339_v15  ;;  %v413_v4 = vadd.f32 %v397_v63, %v340_v10 }
  0xdc   :  { %v402_v42 = vmul.f32 %v386_v30, %v885_v50  ;;  %v394_v11 = vmul.f32 %v386_v30, %v376_v41  ;;  %v419_v19 = vadd.f32 %v403_v55, %v955_v38  ;;  %v390_v60 = vmul.f32 %v386_v30, %v372_v56 }
  0xdd   :  { %v411_v14 = vadd.f32 %v395_v61, %v338_v29  ;;  %v407_v6 = vadd.f32 %v391_v22, %v969_v34  ;;  %v445_v32 = vadd.f32 %v428_v47, %v413_v4 }
  0xde   :  { %v418_v40 = vadd.f32 %v402_v42, %v950_v44  ;;  %v410_v1 = vadd.f32 %v394_v11, %v337_v57  ;;  %v406_v27 = vadd.f32 %v390_v60, %v967_v33  ;;  %v408_v33 = vadd.f32 %v392_v21, %v971_v20 }
  0xdf   :  { %v380_v54 = vpop.permute.xlu1 %379  ;;  %v443_v53 = vadd.f32 %v428_v47, %v411_v14  ;;  %v439_v46 = vadd.f32 %v424_v3, %v407_v6  ;;  %v461_v55 = vmax.f32 %v445_v32, 0.0 }
  0xe0   :  { %v398_v50 = vmul.f32 %v386_v30, %v380_v54  ;;  %v399_v8 = vmul.f32 %v387_v16, %v380_v54  ;;  %v400_v39 = vmul.f32 %v388_v52, %v380_v54  ;;  %v401_v49 = vmul.f32 %v389_v35, %v380_v54 }
  0xe1   :  { %v442_v43 = vadd.f32 %v428_v47, %v410_v1  ;;  %v409_v30 = vadd.f32 %v393_v13, %v973_v45  ;;  %v444_v54 = vadd.f32 %v428_v47, %v412_v7  ;;  %v459_v20 = vmax.f32 %v443_v53, 0.0 }
  0xe2   :  { %v414_v36 = vadd.f32 %v398_v50, %v999_v25  ;;  %v415_v17 = vadd.f32 %v399_v8, %v1001_v2  ;;  %v416_v31 = vadd.f32 %v400_v39, %v1003_v28  ;;  %v417_v57 = vadd.f32 %v401_v49, %v1005_v5 }
  0xe3   :  { %v438_v25 = vadd.f32 %v424_v3, %v406_v27  ;;  %v440_v5 = vadd.f32 %v424_v3, %v408_v33  ;;  %v441_v41 = vadd.f32 %v424_v3, %v409_v30  ;;  %v458_v42 = vmax.f32 %v442_v43, 0.0 }
  0xe4   :  { %v460_v45 = vmax.f32 %v444_v54, 0.0  ;;  %v455_v58 = vmax.f32 %v439_v46, 0.0 }
  0xe5   :  { %v454_v56 = vmax.f32 %v438_v25, 0.0  ;;  %v456_v59 = vmax.f32 %v440_v5, 0.0  ;;  %v457_v11 = vmax.f32 %v441_v41, 0.0 }
  0xe8   :  { %v436_v23 = vpop.permute.xlu1 %435 }
  0xe9   :  { %v450_v24 = vadd.f32 %v436_v23, %v418_v40  ;;  %v451_v12 = vadd.f32 %v436_v23, %v419_v19  ;;  %v452_v9 = vadd.f32 %v436_v23, %v420_v51  ;;  %v453_v0 = vadd.f32 %v436_v23, %v421_v26 }
  0xeb   :  { %v466_v44 = vmax.f32 %v450_v24, 0.0  ;;  %v467_v37 = vmax.f32 %v451_v12, 0.0  ;;  %v468_v38 = vmax.f32 %v452_v9, 0.0  ;;  %v469_v48 = vmax.f32 %v453_v0, 0.0 }
  0xed   :  { %491 = vmatpush.msra.mxu0 %v466_v44  ;;  %511 = vmatpush.msra.mxu1 %v467_v37 }
  0xee   :  { %531 = vmatpush.msra.mxu2 %v468_v38  ;;  %551 = vmatpush.msra.mxu3 %v469_v48 }
  0xf0   :  { %v432_v29 = vpop.permute.xlu1 %431 }
  0xf1   :  { %v446_v15 = vadd.f32 %v432_v29, %v414_v36  ;;  %v447_v10 = vadd.f32 %v432_v29, %v415_v17  ;;  %v448_v16 = vadd.f32 %v432_v29, %v416_v31  ;;  %v449_v34 = vadd.f32 %v432_v29, %v417_v57 }
  0xf3   :  { %v462_v2 = vmax.f32 %v446_v15, 0.0  ;;  %v463_v52 = vmax.f32 %v447_v10, 0.0  ;;  %v464_v28 = vmax.f32 %v448_v16, 0.0  ;;  %v465_v35 = vmax.f32 %v449_v34, 0.0 }
  0xf5   :  { %492 = vmatpush.msra.mxu0 %v462_v2  ;;  %512 = vmatpush.msra.mxu1 %v463_v52 }
  0xf6   :  { %532 = vmatpush.msra.mxu2 %v464_v28  ;;  %552 = vmatpush.msra.mxu3 %v465_v35 }
  0xf7   :  { %493 = vmatpush.msra.mxu0 %v458_v42  ;;  %513 = vmatpush.msra.mxu1 %v459_v20 }
  0xf8   :  { %533 = vmatpush.msra.mxu2 %v460_v45  ;;  %553 = vmatpush.msra.mxu3 %v461_v55 }
  0xf9   :  { %494 = vmatpush.msra.mxu0 %v454_v56  ;;  %514 = vmatpush.msra.mxu1 %v455_v58 }
  0xfa   :  { %534 = vmatpush.msra.mxu2 %v456_v59  ;;  %554 = vmatpush.msra.mxu3 %v457_v11 }
  0xfb   :  { %641 = vmatmul.msk.f32.vlgmr.msra.gmra.mxu0 %vm476_vm12, %v1040_v18  ;;  %642 = vmatmul.msk.f32.vlgmr.msra.gmra.mxu1 %vm476_vm12, %v1040_v18 }
  0xfc   :  { %643 = vmatmul.msk.f32.vlgmr.msra.gmra.mxu2 %vm476_vm12, %v1040_v18  ;;  %644 = vmatmul.msk.f32.vlgmr.msra.gmra.mxu3 %vm476_vm12, %v1040_v18 }
 0x14c   :  { %v474_v62 = vpop.permute.xlu1 %473 }
 0x178   :  { %v496_v40 = vpop.f32.mrf.mxu0  ;;  %v516_v19 = vpop.f32.mrf.mxu1 }
 0x179   :  { %v497_v51 = vadd.f32 %v496_v40, %v474_v62  ;;  %v517_v26 = vadd.f32 %v516_v19, %v474_v62 }
 0x17b   :  { %v559_v61 = vrot.slane %v497_v51, 4  ;;  %v565_v63 = vrot.slane %v517_v26, 4 }
 0x17d   :  { %v560_v60 = vmax.f32 %v497_v51, %v559_v61  ;;  %v566_v22 = vmax.f32 %v517_v26, %v565_v63 }
 0x17f   :  { %v561_v23 = vrot.slane %v560_v60, 2  ;;  %v567_v24 = vrot.slane %v566_v22, 2  ;;  %v536_v12 = vpop.f32.mrf.mxu2  ;;  %v556_v9 = vpop.f32.mrf.mxu3 }
 0x180   :  { %v537_v0 = vadd.f32 %v536_v12, %v474_v62  ;;  %v557_v50 = vadd.f32 %v556_v9, %v474_v62 }
 0x181   :  { %v562_v8 = vmax.f32 %v560_v60, %v561_v23  ;;  %v568_v39 = vmax.f32 %v566_v22, %v567_v24 }
 0x182   :  { %v571_v49 = vrot.slane %v537_v0, 4  ;;  %v577_v44 = vrot.slane %v557_v50, 4 }
 0x183   :  { %v563_v18 = vrot.slane %v562_v8, 1  ;;  %v569_v37 = vrot.slane %v568_v39, 1 }
 0x184   :  { %v572_v38 = vmax.f32 %v537_v0, %v571_v49  ;;  %v578_v48 = vmax.f32 %v557_v50, %v577_v44 }
 0x185   :  { %v564_v21 = vmax.f32 %v562_v8, %v563_v18  ;;  %v570_v13 = vmax.f32 %v568_v39, %v569_v37 }
 0x186   :  { %v573_v1 = vrot.slane %v572_v38, 2  ;;  %v579_v14 = vrot.slane %v578_v48, 2 }
 0x187   :  { %v583_v47 = vsub.f32 %v497_v51, %v564_v21  ;;  %v584_v27 = vsub.f32 %v517_v26, %v570_v13 }
 0x188   :  { %v574_v7 = vmax.f32 %v572_v38, %v573_v1  ;;  %v580_v4 = vmax.f32 %v578_v48, %v579_v14 }
 0x189   :  { %v587_v6 = vmul.f32 1.442695, %v583_v47  ;;  %v589_v3 = vmul.f32 1.442695, %v584_v27 }
 0x18a   :  { %v575_v36 = vrot.slane %v574_v7, 1  ;;  %v581_v17 = vrot.slane %v580_v4, 1 }
 0x18b   :  { %683 = vpow2.f32 %v587_v6 }
 0x18c   :  { %685 = vpow2.f32 %v589_v3  ;;  %v576_v31 = vmax.f32 %v574_v7, %v575_v36  ;;  %v582_v57 = vmax.f32 %v580_v4, %v581_v17 }
 0x18e   :  { %v585_v29 = vsub.f32 %v537_v0, %v576_v31  ;;  %v586_v43 = vsub.f32 %v557_v50, %v582_v57 }
 0x190   :  { %v591_v53 = vmul.f32 1.442695, %v585_v29  ;;  %v593_v33 = vmul.f32 1.442695, %v586_v43 }
 0x191   :  { %v684_v30 = vpop.eup %683 }
 0x192   :  { %v686_v15 = vpop.eup %685  ;;  %v595_v10 = vrot.slane %v684_v30, 4  ;;  %687 = vpow2.f32 %v591_v53 }
 0x193   :  { %v601_v16 = vrot.slane %v686_v15, 4  ;;  %689 = vpow2.f32 %v593_v33 }
 0x194   :  { %v596_v34 = vadd.f32 %v684_v30, %v595_v10 }
 0x195   :  { %v602_v54 = vadd.f32 %v686_v15, %v601_v16 }
 0x196   :  { %v597_v32 = vrot.slane %v596_v34, 2 }
 0x197   :  { %v603_v25 = vrot.slane %v602_v54, 2 }
 0x198   :  { %v688_v46 = vpop.eup %687  ;;  %v598_v2 = vadd.f32 %v597_v32, %v596_v34 }
 0x199   :  { %v690_v52 = vpop.eup %689  ;;  %v604_v28 = vadd.f32 %v603_v25, %v602_v54  ;;  %v607_v35 = vrot.slane %v688_v46, 4 }
 0x19a   :  { %v599_v5 = vrot.slane %v598_v2, 1  ;;  %v613_v41 = vrot.slane %v690_v52, 4 }
 0x19b   :  { %v605_v42 = vrot.slane %v604_v28, 1  ;;  %v608_v20 = vadd.f32 %v688_v46, %v607_v35 }
 0x19c   :  { %v600_v45 = vadd.f32 %v599_v5, %v598_v2  ;;  %v614_v55 = vadd.f32 %v690_v52, %v613_v41 }
 0x19d   :  { %v606_v56 = vadd.f32 %v605_v42, %v604_v28  ;;  %v609_v58 = vrot.slane %v608_v20, 2 }
 0x19e   :  { %691 = vlog2.f32 %v600_v45  ;;  %v615_v59 = vrot.slane %v614_v55, 2 }
 0x19f   :  { %693 = vlog2.f32 %v606_v56  ;;  %v610_v11 = vadd.f32 %v609_v58, %v608_v20 }
 0x1a0   :  { %v616_v62 = vadd.f32 %v615_v59, %v614_v55 }
 0x1a1   :  { %v611_v40 = vrot.slane %v610_v11, 1 }
 0x1a2   :  { %v617_v19 = vrot.slane %v616_v62, 1 }
 0x1a3   :  { %v612_v51 = vadd.f32 %v611_v40, %v610_v11 }
 0x1a4   :  { %v692_v26 = vpop.eup %691  ;;  %v618_v61 = vadd.f32 %v617_v19, %v616_v62 }
 0x1a5   :  { %v694_v63 = vpop.eup %693  ;;  %v620_v60 = vmul.f32 0.6931472, %v692_v26  ;;  %695 = vlog2.f32 %v612_v51 }
 0x1a6   :  { %v622_v22 = vmul.f32 0.6931472, %v694_v63  ;;  %697 = vlog2.f32 %v618_v61 }
 0x1a7   :  { %v627_v23 = vsub.f32 %v583_v47, %v620_v60 }
 0x1a8   :  { %v628_v24 = vsub.f32 %v584_v27, %v622_v22 }
 0x1a9   :  { %631 = vst [vmem:[%s1081_s2] sm:$0xff] %v627_v23 }
 0x1aa   :  { %632 = vst [vmem:[%s1081_s2 + $0x8] sm:$0xff] %v628_v24 }
 0x1ab   :  { %v696_v12 = vpop.eup %695 }
 0x1ac   :  { %v698_v9 = vpop.eup %697  ;;  %v624_v0 = vmul.f32 0.6931472, %v696_v12 }
 0x1ad   :  { %v626_v50 = vmul.f32 0.6931472, %v698_v9 }
 0x1ae   :  { %v629_v8 = vsub.f32 %v585_v29, %v624_v0 }
 0x1af   :  { %v630_v39 = vsub.f32 %v586_v43, %v626_v50 }
 0x1b0   :  { %645 = vst [vmem:[%s1081_s2 + $0x10] sm:$0xff] %v629_v8 }
 0x1b1   :  { %646 = vst [vmem:[%s1081_s2 + $0x18] sm:$0xff] %v630_v39 }
 0x1b2   :  { %640 = vsyncpa [#allocation3], 1 }

</bundles_post_ra>
